<compile_context>
chip_gen: v6e
topology: v6e:2x2x1
jax: 0.10.0
libtpu: 0.0.40
codegen_flags: <defaults>
</compile_context>

<pallas_src>
import math
import functools

import jax
import jax.numpy as jnp
from jax import lax
from jax.experimental import pallas as pl
from jax.experimental.pallas import tpu as pltpu


def _flash_attention_kernel(xq_ref, xkv_ref, wq_ref, wkv_ref, bq_ref, bkv_ref,
                            o_ref, q_s, m_s, l_s, acc_s,
                            *, head_size, tq, tk, scale):
    # xq_ref:  (1, tq, E)   xkv_ref: (1, tk, E)
    # wq_ref:  (E, H)       wkv_ref: (E, 2H)
    # bq_ref:  (1, H)       bkv_ref: (1, 2H)
    # o_ref:   (1, tq, H)
    # scratch: q_s (tq, H) input dtype; m_s/l_s (tq, 1) f32; acc_s (tq, H) f32
    qi = pl.program_id(1)
    ki = pl.program_id(2)
    nk = pl.num_programs(2)
    dot_dtype = xq_ref.dtype

    q_start = qi * tq
    k_start = ki * tk

    # --- init (once per (b, qi)): project + pre-scale q, reset online-softmax state.
    @pl.when(ki == 0)
    def _init():
        xq = xq_ref[0]
        q = jnp.dot(xq, wq_ref[...], preferred_element_type=jnp.float32)
        q = q + bq_ref[...].astype(jnp.float32)
        q_s[...] = (q * scale).astype(q_s.dtype)
        m_s[...] = jnp.full(m_s.shape, -jnp.inf, dtype=m_s.dtype)
        l_s[...] = jnp.zeros(l_s.shape, dtype=l_s.dtype)
        acc_s[...] = jnp.zeros(acc_s.shape, dtype=acc_s.dtype)

    def _accumulate(apply_mask):
        # Fused K|V projection for this KV block.
        xkv = xkv_ref[0]
        kv = jnp.dot(xkv, wkv_ref[...], preferred_element_type=jnp.float32)
        kv = kv + bkv_ref[...].astype(jnp.float32)
        k = kv[:, :head_size].astype(dot_dtype)
        v = kv[:, head_size:].astype(dot_dtype)

        # scores = (q * scale) @ k^T, contracting last axes (no explicit transpose).
        s = lax.dot_general(q_s[...], k, (((1,), (1,)), ((), ())),
                            preferred_element_type=jnp.float32)

        if apply_mask:  # only the diagonal-straddling block needs the causal mask
            row = q_start + lax.broadcasted_iota(jnp.int32, (tq, tk), 0)
            col = k_start + lax.broadcasted_iota(jnp.int32, (tq, tk), 1)
            s = jnp.where(col <= row, s, -jnp.inf)

        # online softmax update
        m_prev = m_s[...]
        m_new = jnp.maximum(m_prev, jnp.max(s, axis=-1, keepdims=True))
        alpha = jnp.exp(m_prev - m_new)
        p = jnp.exp(s - m_new)
        l_s[...] = alpha * l_s[...] + jnp.sum(p, axis=-1, keepdims=True)
        acc_s[...] = alpha * acc_s[...] + jnp.dot(p.astype(dot_dtype), v,
                                                  preferred_element_type=jnp.float32)
        m_s[...] = m_new

    # Causal block classification (static tile sizes, traced block indices).
    contributes = k_start < q_start + tq            # block has at least one col <= row
    fully_unmasked = k_start + tk - 1 <= q_start    # every col <= every row

    @pl.when(jnp.logical_and(contributes, fully_unmasked))
    def _below_diagonal():
        _accumulate(apply_mask=False)

    @pl.when(jnp.logical_and(contributes, jnp.logical_not(fully_unmasked)))
    def _on_diagonal():
        _accumulate(apply_mask=True)

    # --- finalize (last KV step): normalize and store.
    @pl.when(ki == nk - 1)
    def _finalize():
        inv_l = pl.reciprocal(l_s[...], approx=True)
        o_ref[0] = (acc_s[...] * inv_l).astype(o_ref.dtype)


def _pick_tile(T, preferred=(512, 256, 128, 64, 32, 16, 8)):
    for t in preferred:
        if T % t == 0:
            return t
    return T


def single_head_attention(x, wq, wk, wv, bq, bk, bv):
    """x: (B, T, E); wq/wk/wv: (E, H); bq/bk/bv: (1, H) -> (B, T, H)."""
    B, T, E = x.shape
    H = wq.shape[1]

    tq = _pick_tile(T)
    tk = _pick_tile(T)
    nq = T // tq
    nk = T // tk

    # Fuse K and V projections into one wide MXU pass.
    wkv = jnp.concatenate([wk, wv], axis=1)   # (E, 2H)
    bkv = jnp.concatenate([bk, bv], axis=1)   # (1, 2H)

    kernel = functools.partial(
        _flash_attention_kernel,
        head_size=H, tq=tq, tk=tk, scale=1.0 / math.sqrt(H))

    return pl.pallas_call(
        kernel,
        out_shape=jax.ShapeDtypeStruct((B, T, H), x.dtype),
        grid_spec=pltpu.PrefetchScalarGridSpec(
            num_scalar_prefetch=0,
            grid=(B, nq, nk),
            in_specs=[
                pl.BlockSpec((1, tq, E), lambda b, qi, ki: (b, qi, 0)),   # x for q block
                pl.BlockSpec((1, tk, E), lambda b, qi, ki: (b, ki, 0)),   # x for kv block
                pl.BlockSpec((E, H), lambda b, qi, ki: (0, 0)),           # wq
                pl.BlockSpec((E, 2 * H), lambda b, qi, ki: (0, 0)),       # wk|wv
                pl.BlockSpec((1, H), lambda b, qi, ki: (0, 0)),           # bq
                pl.BlockSpec((1, 2 * H), lambda b, qi, ki: (0, 0)),       # bk|bv
            ],
            out_specs=pl.BlockSpec((1, tq, H), lambda b, qi, ki: (b, qi, 0)),
            scratch_shapes=[
                pltpu.VMEM((tq, H), x.dtype),       # pre-scaled q
                pltpu.VMEM((tq, 1), jnp.float32),   # running max m
                pltpu.VMEM((tq, 1), jnp.float32),   # running sum l
                pltpu.VMEM((tq, H), jnp.float32),   # output accumulator
            ]),
        compiler_params=pltpu.CompilerParams(
            dimension_semantics=("parallel", "parallel", "arbitrary")),
    )(x, x, wq, wkv, bq, bkv)


def _init_linear(key, fan_in, fan_out):
    # Mimic torch.nn.Linear default init: U(-1/sqrt(fan_in), 1/sqrt(fan_in))
    kw, kb = jax.random.split(key)
    bound = 1.0 / math.sqrt(fan_in)
    w = jax.random.uniform(kw, (fan_in, fan_out), jnp.float32, -bound, bound)
    b = jax.random.uniform(kb, (1, fan_out), jnp.float32, -bound, bound)
    return w, b


def _reference(x, wq, wk, wv, bq, bk, bv):
    q = x @ wq + bq
    k = x @ wk + bk
    v = x @ wv + bv
    s = q @ jnp.swapaxes(k, -2, -1)
    T = x.shape[1]
    mask = jnp.tril(jnp.ones((T, T), dtype=bool))
    s = jnp.where(mask, s, -jnp.inf) / math.sqrt(wq.shape[1])
    w = jax.nn.softmax(s, axis=-1)
    return w @ v


if __name__ == "__main__":
    # Small config: batch=2, seq=8, n_embed=32, head_size=16, block_size=8
    B, T, E, H = 2, 8, 32, 16

    key = jax.random.PRNGKey(0)
    kx, kq, kk, kv = jax.random.split(key, 4)

    x = jax.random.normal(kx, (B, T, E), dtype=jnp.float32)
    wq, bq = _init_linear(kq, E, H)
    wk, bk = _init_linear(kk, E, H)
    wv, bv = _init_linear(kv, E, H)

    out = single_head_attention(x, wq, wk, wv, bq, bk, bv)
    out = jax.block_until_ready(out)

    ref = _reference(x, wq, wk, wv, bq, bk, bv)
    assert out.shape == (B, T, H)
    # Tolerance loosened slightly for the approx EUP reciprocal in the softmax normalizer.
    assert jnp.allclose(out, ref, atol=2e-3, rtol=2e-3), "mismatch vs reference"

    print("KERNEL_OK")
</pallas_src>

<mosaic_0001>
module attributes {stable_mosaic.version = 11 : i64} {
  func.func @_flash_attention_kernel(%arg0: i32, %arg1: i32, %arg2: i32, %arg3: memref<1x8x32xf32, #tpu.memory_space<vmem>>, %arg4: memref<1x8x32xf32, #tpu.memory_space<vmem>>, %arg5: memref<32x16xf32, #tpu.memory_space<vmem>>, %arg6: memref<32x32xf32, #tpu.memory_space<vmem>>, %arg7: memref<1x16xf32, #tpu.memory_space<vmem>>, %arg8: memref<1x32xf32, #tpu.memory_space<vmem>>, %arg9: memref<1x8x16xf32, #tpu.memory_space<vmem>>, %arg10: memref<8x16xf32, #tpu.memory_space<vmem>>, %arg11: memref<8x1xf32, #tpu.memory_space<vmem>>, %arg12: memref<8x1xf32, #tpu.memory_space<vmem>>, %arg13: memref<8x16xf32, #tpu.memory_space<vmem>>) attributes {dimension_semantics = [#tpu.dimension_semantics<parallel>, #tpu.dimension_semantics<parallel>, #tpu.dimension_semantics<arbitrary>], iteration_bounds = array<i64: 2, 1, 1>, scalar_prefetch = 0 : i64, scratch_operands = 4 : i64, tpu.core_type = #tpu.core_type<tc>, window_params = [{transform_indices = @transform_0, window_bounds = array<i64: 1, 8, 32>}, {transform_indices = @transform_1, window_bounds = array<i64: 1, 8, 32>}, {pipeline_mode = #tpu.pipeline_mode<synchronous>, transform_indices = @transform_2, window_bounds = array<i64: 32, 16>}, {pipeline_mode = #tpu.pipeline_mode<synchronous>, transform_indices = @transform_3, window_bounds = array<i64: 32, 32>}, {pipeline_mode = #tpu.pipeline_mode<synchronous>, transform_indices = @transform_4, window_bounds = array<i64: 1, 16>}, {pipeline_mode = #tpu.pipeline_mode<synchronous>, transform_indices = @transform_5, window_bounds = array<i64: 1, 32>}, {transform_indices = @transform_6, window_bounds = array<i64: 1, 8, 16>}]} {
    %c8_i32 = arith.constant 8 : i32
    %0 = arith.muli %arg1, %c8_i32 : i32
    %c8_i32_0 = arith.constant 8 : i32
    %1 = arith.muli %arg2, %c8_i32_0 : i32
    %c0_i32 = arith.constant 0 : i32
    %2 = arith.cmpi eq, %arg2, %c0_i32 : i32
    %3 = arith.extui %2 : i1 to i32
    %c0_i32_1 = arith.constant 0 : i32
    %4 = arith.cmpi ne, %3, %c0_i32_1 : i32
    scf.if %4 {
      %c0 = arith.constant 0 : index
      %c0_8 = arith.constant 0 : index
      %c0_9 = arith.constant 0 : index
      %20 = vector.load %arg3[%c0, %c0_8, %c0_9] : memref<1x8x32xf32, #tpu.memory_space<vmem>>, vector<1x8x32xf32>
      %21 = vector.shape_cast %20 : vector<1x8x32xf32> to vector<8x32xf32>
      %c0_10 = arith.constant 0 : index
      %c0_11 = arith.constant 0 : index
      %22 = vector.load %arg5[%c0_10, %c0_11] : memref<32x16xf32, #tpu.memory_space<vmem>>, vector<32x16xf32>
      %cst = arith.constant dense<0.000000e+00> : vector<8x16xf32>
      %23 = tpu.matmul %21, %22, %cst {dimension_numbers = #tpu.dot_dimension_numbers<[1], [0], [0], [1], [0, 0, 1, 1], [], []>} : vector<8x32xf32>, vector<32x16xf32>, vector<8x16xf32> -> vector<8x16xf32>
      %c0_12 = arith.constant 0 : index
      %c0_13 = arith.constant 0 : index
      %24 = vector.load %arg7[%c0_12, %c0_13] : memref<1x16xf32, #tpu.memory_space<vmem>>, vector<1x16xf32>
      %25 = vector.broadcast %24 : vector<1x16xf32> to vector<8x16xf32>
      %26 = arith.addf %23, %25 : vector<8x16xf32>
      %cst_14 = arith.constant 2.500000e-01 : f32
      %27 = vector.broadcast %cst_14 : f32 to vector<8x16xf32>
      %28 = arith.mulf %26, %27 : vector<8x16xf32>
      %c0_15 = arith.constant 0 : index
      %c0_16 = arith.constant 0 : index
      %29 = vector.load %arg10[%c0_15, %c0_16] : memref<8x16xf32, #tpu.memory_space<vmem>>, vector<8x16xf32>
      tpu.vector_store %arg10[%c0_15, %c0_16], %28 {strides = array<i32>} : memref<8x16xf32, #tpu.memory_space<vmem>>, vector<8x16xf32>,
      %cst_17 = arith.constant 0xFF800000 : f32
      %30 = vector.broadcast %cst_17 : f32 to vector<8x1xf32>
      %c0_18 = arith.constant 0 : index
      %c0_19 = arith.constant 0 : index
      %31 = vector.load %arg11[%c0_18, %c0_19] : memref<8x1xf32, #tpu.memory_space<vmem>>, vector<8x1xf32>
      tpu.vector_store %arg11[%c0_18, %c0_19], %30 {strides = array<i32>} : memref<8x1xf32, #tpu.memory_space<vmem>>, vector<8x1xf32>,
      %cst_20 = arith.constant 0.000000e+00 : f32
      %32 = vector.broadcast %cst_20 : f32 to vector<8x1xf32>
      %c0_21 = arith.constant 0 : index
      %c0_22 = arith.constant 0 : index
      %33 = vector.load %arg12[%c0_21, %c0_22] : memref<8x1xf32, #tpu.memory_space<vmem>>, vector<8x1xf32>
      tpu.vector_store %arg12[%c0_21, %c0_22], %32 {strides = array<i32>} : memref<8x1xf32, #tpu.memory_space<vmem>>, vector<8x1xf32>,
      %cst_23 = arith.constant 0.000000e+00 : f32
      %34 = vector.broadcast %cst_23 : f32 to vector<8x16xf32>
      %c0_24 = arith.constant 0 : index
      %c0_25 = arith.constant 0 : index
      %35 = vector.load %arg13[%c0_24, %c0_25] : memref<8x16xf32, #tpu.memory_space<vmem>>, vector<8x16xf32>
      tpu.vector_store %arg13[%c0_24, %c0_25], %34 {strides = array<i32>} : memref<8x16xf32, #tpu.memory_space<vmem>>, vector<8x16xf32>,
    } else {
    }
    %c8_i32_2 = arith.constant 8 : i32
    %5 = arith.addi %0, %c8_i32_2 : i32
    %6 = arith.cmpi slt, %1, %5 : i32
    %c8_i32_3 = arith.constant 8 : i32
    %7 = arith.addi %1, %c8_i32_3 : i32
    %c1_i32 = arith.constant 1 : i32
    %8 = arith.subi %7, %c1_i32 : i32
    %9 = arith.cmpi sle, %8, %0 : i32
    %10 = arith.andi %6, %9 : i1
    %11 = arith.extui %10 : i1 to i32
    %c0_i32_4 = arith.constant 0 : i32
    %12 = arith.cmpi ne, %11, %c0_i32_4 : i32
    scf.if %12 {
      %c0 = arith.constant 0 : index
      %c0_8 = arith.constant 0 : index
      %c0_9 = arith.constant 0 : index
      %20 = vector.load %arg4[%c0, %c0_8, %c0_9] : memref<1x8x32xf32, #tpu.memory_space<vmem>>, vector<1x8x32xf32>
      %21 = vector.shape_cast %20 : vector<1x8x32xf32> to vector<8x32xf32>
      %c0_10 = arith.constant 0 : index
      %c0_11 = arith.constant 0 : index
      %22 = vector.load %arg6[%c0_10, %c0_11] : memref<32x32xf32, #tpu.memory_space<vmem>>, vector<32x32xf32>
      %cst = arith.constant dense<0.000000e+00> : vector<8x32xf32>
      %23 = tpu.matmul %21, %22, %cst {dimension_numbers = #tpu.dot_dimension_numbers<[1], [0], [0], [1], [0, 0, 1, 1], [], []>} : vector<8x32xf32>, vector<32x32xf32>, vector<8x32xf32> -> vector<8x32xf32>
      %c0_12 = arith.constant 0 : index
      %c0_13 = arith.constant 0 : index
      %24 = vector.load %arg8[%c0_12, %c0_13] : memref<1x32xf32, #tpu.memory_space<vmem>>, vector<1x32xf32>
      %25 = vector.broadcast %24 : vector<1x32xf32> to vector<8x32xf32>
      %26 = arith.addf %23, %25 : vector<8x32xf32>
      %27 = vector.extract_strided_slice %26 {offsets = [0, 0], sizes = [8, 16], strides = [1, 1]} : vector<8x32xf32> to vector<8x16xf32>
      %28 = vector.extract_strided_slice %26 {offsets = [0, 16], sizes = [8, 16], strides = [1, 1]} : vector<8x32xf32> to vector<8x16xf32>
      %c0_14 = arith.constant 0 : index
      %c0_15 = arith.constant 0 : index
      %29 = vector.load %arg10[%c0_14, %c0_15] : memref<8x16xf32, #tpu.memory_space<vmem>>, vector<8x16xf32>
      %cst_16 = arith.constant dense<0.000000e+00> : vector<8x8xf32>
      %30 = tpu.matmul %29, %27, %cst_16 {dimension_numbers = #tpu.dot_dimension_numbers<[1], [1], [0], [0], [0, 0, 1, 0], [], []>} : vector<8x16xf32>, vector<8x16xf32>, vector<8x8xf32> -> vector<8x8xf32>
      %c0_17 = arith.constant 0 : index
      %c0_18 = arith.constant 0 : index
      %31 = vector.load %arg11[%c0_17, %c0_18] : memref<8x1xf32, #tpu.memory_space<vmem>>, vector<8x1xf32>
      %cst_19 = arith.constant dense<0xFF800000> : vector<8xf32>
      %32 = vector.multi_reduction <maximumf>, %30, %cst_19 [1] : vector<8x8xf32> to vector<8xf32>
      %33 = vector.shape_cast %32 : vector<8xf32> to vector<8x1xf32>
      %34 = arith.maximumf %31, %33 : vector<8x1xf32>
      %35 = arith.subf %31, %34 : vector<8x1xf32>
      %36 = math.exp %35 : vector<8x1xf32>
      %37 = vector.broadcast %34 : vector<8x1xf32> to vector<8x8xf32>
      %38 = arith.subf %30, %37 : vector<8x8xf32>
      %39 = math.exp %38 : vector<8x8xf32>
      %c0_20 = arith.constant 0 : index
      %c0_21 = arith.constant 0 : index
      %40 = vector.load %arg12[%c0_20, %c0_21] : memref<8x1xf32, #tpu.memory_space<vmem>>, vector<8x1xf32>
      %41 = arith.mulf %36, %40 : vector<8x1xf32>
      %cst_22 = arith.constant dense<0.000000e+00> : vector<8xf32>
      %42 = vector.multi_reduction <add>, %39, %cst_22 [1] : vector<8x8xf32> to vector<8xf32>
      %43 = vector.shape_cast %42 : vector<8xf32> to vector<8x1xf32>
      %44 = arith.addf %41, %43 : vector<8x1xf32>
      %c0_23 = arith.constant 0 : index
      %c0_24 = arith.constant 0 : index
      %45 = vector.load %arg12[%c0_23, %c0_24] : memref<8x1xf32, #tpu.memory_space<vmem>>, vector<8x1xf32>
      tpu.vector_store %arg12[%c0_23, %c0_24], %44 {strides = array<i32>} : memref<8x1xf32, #tpu.memory_space<vmem>>, vector<8x1xf32>,
      %c0_25 = arith.constant 0 : index
      %c0_26 = arith.constant 0 : index
      %46 = vector.load %arg13[%c0_25, %c0_26] : memref<8x16xf32, #tpu.memory_space<vmem>>, vector<8x16xf32>
      %47 = vector.broadcast %36 : vector<8x1xf32> to vector<8x16xf32>
      %48 = arith.mulf %47, %46 : vector<8x16xf32>
      %cst_27 = arith.constant dense<0.000000e+00> : vector<8x16xf32>
      %49 = tpu.matmul %39, %28, %cst_27 {dimension_numbers = #tpu.dot_dimension_numbers<[1], [0], [0], [1], [0, 0, 1, 1], [], []>} : vector<8x8xf32>, vector<8x16xf32>, vector<8x16xf32> -> vector<8x16xf32>
      %50 = arith.addf %48, %49 : vector<8x16xf32>
      %c0_28 = arith.constant 0 : index
      %c0_29 = arith.constant 0 : index
      %51 = vector.load %arg13[%c0_28, %c0_29] : memref<8x16xf32, #tpu.memory_space<vmem>>, vector<8x16xf32>
      tpu.vector_store %arg13[%c0_28, %c0_29], %50 {strides = array<i32>} : memref<8x16xf32, #tpu.memory_space<vmem>>, vector<8x16xf32>,
      %c0_30 = arith.constant 0 : index
      %c0_31 = arith.constant 0 : index
      %52 = vector.load %arg11[%c0_30, %c0_31] : memref<8x1xf32, #tpu.memory_space<vmem>>, vector<8x1xf32>
      tpu.vector_store %arg11[%c0_30, %c0_31], %34 {strides = array<i32>} : memref<8x1xf32, #tpu.memory_space<vmem>>, vector<8x1xf32>,
    } else {
    }
    %true = arith.constant true
    %13 = arith.xori %9, %true : i1
    %14 = arith.andi %6, %13 : i1
    %15 = arith.extui %14 : i1 to i32
    %c0_i32_5 = arith.constant 0 : i32
    %16 = arith.cmpi ne, %15, %c0_i32_5 : i32
    scf.if %16 {
      %c0 = arith.constant 0 : index
      %c0_8 = arith.constant 0 : index
      %c0_9 = arith.constant 0 : index
      %20 = vector.load %arg4[%c0, %c0_8, %c0_9] : memref<1x8x32xf32, #tpu.memory_space<vmem>>, vector<1x8x32xf32>
      %21 = vector.shape_cast %20 : vector<1x8x32xf32> to vector<8x32xf32>
      %c0_10 = arith.constant 0 : index
      %c0_11 = arith.constant 0 : index
      %22 = vector.load %arg6[%c0_10, %c0_11] : memref<32x32xf32, #tpu.memory_space<vmem>>, vector<32x32xf32>
      %cst = arith.constant dense<0.000000e+00> : vector<8x32xf32>
      %23 = tpu.matmul %21, %22, %cst {dimension_numbers = #tpu.dot_dimension_numbers<[1], [0], [0], [1], [0, 0, 1, 1], [], []>} : vector<8x32xf32>, vector<32x32xf32>, vector<8x32xf32> -> vector<8x32xf32>
      %c0_12 = arith.constant 0 : index
      %c0_13 = arith.constant 0 : index
      %24 = vector.load %arg8[%c0_12, %c0_13] : memref<1x32xf32, #tpu.memory_space<vmem>>, vector<1x32xf32>
      %25 = vector.broadcast %24 : vector<1x32xf32> to vector<8x32xf32>
      %26 = arith.addf %23, %25 : vector<8x32xf32>
      %27 = vector.extract_strided_slice %26 {offsets = [0, 0], sizes = [8, 16], strides = [1, 1]} : vector<8x32xf32> to vector<8x16xf32>
      %28 = vector.extract_strided_slice %26 {offsets = [0, 16], sizes = [8, 16], strides = [1, 1]} : vector<8x32xf32> to vector<8x16xf32>
      %c0_14 = arith.constant 0 : index
      %c0_15 = arith.constant 0 : index
      %29 = vector.load %arg10[%c0_14, %c0_15] : memref<8x16xf32, #tpu.memory_space<vmem>>, vector<8x16xf32>
      %cst_16 = arith.constant dense<0.000000e+00> : vector<8x8xf32>
      %30 = tpu.matmul %29, %27, %cst_16 {dimension_numbers = #tpu.dot_dimension_numbers<[1], [1], [0], [0], [0, 0, 1, 0], [], []>} : vector<8x16xf32>, vector<8x16xf32>, vector<8x8xf32> -> vector<8x8xf32>
      %31 = tpu.iota {dimensions = array<i32: 0>} : vector<8x8xi32>
      %32 = vector.broadcast %0 : i32 to vector<8x8xi32>
      %33 = arith.addi %32, %31 : vector<8x8xi32>
      %34 = tpu.iota {dimensions = array<i32: 1>} : vector<8x8xi32>
      %35 = vector.broadcast %1 : i32 to vector<8x8xi32>
      %36 = arith.addi %35, %34 : vector<8x8xi32>
      %37 = arith.cmpi sle, %36, %33 : vector<8x8xi32>
      %cst_17 = arith.constant 0xFF800000 : f32
      %38 = vector.broadcast %cst_17 : f32 to vector<8x8xf32>
      %39 = arith.select %37, %30, %38 : vector<8x8xi1>, vector<8x8xf32>
      %c0_18 = arith.constant 0 : index
      %c0_19 = arith.constant 0 : index
      %40 = vector.load %arg11[%c0_18, %c0_19] : memref<8x1xf32, #tpu.memory_space<vmem>>, vector<8x1xf32>
      %cst_20 = arith.constant dense<0xFF800000> : vector<8xf32>
      %41 = vector.multi_reduction <maximumf>, %39, %cst_20 [1] : vector<8x8xf32> to vector<8xf32>
      %42 = vector.shape_cast %41 : vector<8xf32> to vector<8x1xf32>
      %43 = arith.maximumf %40, %42 : vector<8x1xf32>
      %44 = arith.subf %40, %43 : vector<8x1xf32>
      %45 = math.exp %44 : vector<8x1xf32>
      %46 = vector.broadcast %43 : vector<8x1xf32> to vector<8x8xf32>
      %47 = arith.subf %39, %46 : vector<8x8xf32>
      %48 = math.exp %47 : vector<8x8xf32>
      %c0_21 = arith.constant 0 : index
      %c0_22 = arith.constant 0 : index
      %49 = vector.load %arg12[%c0_21, %c0_22] : memref<8x1xf32, #tpu.memory_space<vmem>>, vector<8x1xf32>
      %50 = arith.mulf %45, %49 : vector<8x1xf32>
      %cst_23 = arith.constant dense<0.000000e+00> : vector<8xf32>
      %51 = vector.multi_reduction <add>, %48, %cst_23 [1] : vector<8x8xf32> to vector<8xf32>
      %52 = vector.shape_cast %51 : vector<8xf32> to vector<8x1xf32>
      %53 = arith.addf %50, %52 : vector<8x1xf32>
      %c0_24 = arith.constant 0 : index
      %c0_25 = arith.constant 0 : index
      %54 = vector.load %arg12[%c0_24, %c0_25] : memref<8x1xf32, #tpu.memory_space<vmem>>, vector<8x1xf32>
      tpu.vector_store %arg12[%c0_24, %c0_25], %53 {strides = array<i32>} : memref<8x1xf32, #tpu.memory_space<vmem>>, vector<8x1xf32>,
      %c0_26 = arith.constant 0 : index
      %c0_27 = arith.constant 0 : index
      %55 = vector.load %arg13[%c0_26, %c0_27] : memref<8x16xf32, #tpu.memory_space<vmem>>, vector<8x16xf32>
      %56 = vector.broadcast %45 : vector<8x1xf32> to vector<8x16xf32>
      %57 = arith.mulf %56, %55 : vector<8x16xf32>
      %cst_28 = arith.constant dense<0.000000e+00> : vector<8x16xf32>
      %58 = tpu.matmul %48, %28, %cst_28 {dimension_numbers = #tpu.dot_dimension_numbers<[1], [0], [0], [1], [0, 0, 1, 1], [], []>} : vector<8x8xf32>, vector<8x16xf32>, vector<8x16xf32> -> vector<8x16xf32>
      %59 = arith.addf %57, %58 : vector<8x16xf32>
      %c0_29 = arith.constant 0 : index
      %c0_30 = arith.constant 0 : index
      %60 = vector.load %arg13[%c0_29, %c0_30] : memref<8x16xf32, #tpu.memory_space<vmem>>, vector<8x16xf32>
      tpu.vector_store %arg13[%c0_29, %c0_30], %59 {strides = array<i32>} : memref<8x16xf32, #tpu.memory_space<vmem>>, vector<8x16xf32>,
      %c0_31 = arith.constant 0 : index
      %c0_32 = arith.constant 0 : index
      %61 = vector.load %arg11[%c0_31, %c0_32] : memref<8x1xf32, #tpu.memory_space<vmem>>, vector<8x1xf32>
      tpu.vector_store %arg11[%c0_31, %c0_32], %43 {strides = array<i32>} : memref<8x1xf32, #tpu.memory_space<vmem>>, vector<8x1xf32>,
    } else {
    }
    %c0_i32_6 = arith.constant 0 : i32
    %17 = arith.cmpi eq, %arg2, %c0_i32_6 : i32
    %18 = arith.extui %17 : i1 to i32
    %c0_i32_7 = arith.constant 0 : i32
    %19 = arith.cmpi ne, %18, %c0_i32_7 : i32
    scf.if %19 {
      %c0 = arith.constant 0 : index
      %c0_8 = arith.constant 0 : index
      %20 = vector.load %arg12[%c0, %c0_8] : memref<8x1xf32, #tpu.memory_space<vmem>>, vector<8x1xf32>
      %21 = tpu.reciprocal %20 {approx = true} : vector<8x1xf32> -> vector<8x1xf32>
      %c0_9 = arith.constant 0 : index
      %c0_10 = arith.constant 0 : index
      %22 = vector.load %arg13[%c0_9, %c0_10] : memref<8x16xf32, #tpu.memory_space<vmem>>, vector<8x16xf32>
      %23 = vector.broadcast %21 : vector<8x1xf32> to vector<8x16xf32>
      %24 = arith.mulf %22, %23 : vector<8x16xf32>
      %c0_11 = arith.constant 0 : index
      %c0_12 = arith.constant 0 : index
      %c0_13 = arith.constant 0 : index
      %25 = vector.load %arg9[%c0_11, %c0_12, %c0_13] : memref<1x8x16xf32, #tpu.memory_space<vmem>>, vector<1x8x16xf32>
      %26 = vector.shape_cast %25 : vector<1x8x16xf32> to vector<8x16xf32>
      %27 = vector.shape_cast %24 : vector<8x16xf32> to vector<1x8x16xf32>
      tpu.vector_store %arg9[%c0_11, %c0_12, %c0_13], %27 {strides = array<i32>} : memref<1x8x16xf32, #tpu.memory_space<vmem>>, vector<1x8x16xf32>,
    } else {
    }
    return
  }
  func.func @transform_0(%arg0: i32, %arg1: i32, %arg2: i32) -> (i32, i32, i32) {
    %c0_i32 = arith.constant 0 : i32
    %c0_i32_0 = arith.constant 0 : i32
    return %arg0, %arg1, %c0_i32 : i32, i32, i32
  }
  func.func @transform_1(%arg0: i32, %arg1: i32, %arg2: i32) -> (i32, i32, i32) {
    %c0_i32 = arith.constant 0 : i32
    %c0_i32_0 = arith.constant 0 : i32
    return %arg0, %arg2, %c0_i32 : i32, i32, i32
  }
  func.func @transform_2(%arg0: i32, %arg1: i32, %arg2: i32) -> (i32, i32) {
    %c0_i32 = arith.constant 0 : i32
    %c0_i32_0 = arith.constant 0 : i32
    %c0_i32_1 = arith.constant 0 : i32
    return %c0_i32, %c0_i32_0 : i32, i32
  }
  func.func @transform_3(%arg0: i32, %arg1: i32, %arg2: i32) -> (i32, i32) {
    %c0_i32 = arith.constant 0 : i32
    %c0_i32_0 = arith.constant 0 : i32
    %c0_i32_1 = arith.constant 0 : i32
    return %c0_i32, %c0_i32_0 : i32, i32
  }
  func.func @transform_4(%arg0: i32, %arg1: i32, %arg2: i32) -> (i32, i32) {
    %c0_i32 = arith.constant 0 : i32
    %c0_i32_0 = arith.constant 0 : i32
    %c0_i32_1 = arith.constant 0 : i32
    return %c0_i32, %c0_i32_0 : i32, i32
  }
  func.func @transform_5(%arg0: i32, %arg1: i32, %arg2: i32) -> (i32, i32) {
    %c0_i32 = arith.constant 0 : i32
    %c0_i32_0 = arith.constant 0 : i32
    %c0_i32_1 = arith.constant 0 : i32
    return %c0_i32, %c0_i32_0 : i32, i32
  }
  func.func @transform_6(%arg0: i32, %arg1: i32, %arg2: i32) -> (i32, i32, i32) {
    %c0_i32 = arith.constant 0 : i32
    %c0_i32_0 = arith.constant 0 : i32
    return %arg0, %arg1, %c0_i32 : i32, i32, i32
  }
}

</mosaic_0001>

<bundles_post_ra>
// kernel: tpu_custom_call.1
= control target key start
LH: loop header
LB: loop body
LE: loop exit
PB: predicated region body
PF: predicated region fallthrough
CT: control target
= control target key end

     0   :  { %11 = vsyncpa [#allocation7], 0  ;;  %s1610_s0 = inlined_call_operand.vmem [shape: f32[2,8,32], index: 0, kind: input, shape index: {}]   ;;  %s1611_s1 = inlined_call_operand.hbm [shape: f32[2,8,32], index: 1, kind: input, shape index: {}]   ;;  %s1612_s2 = inlined_call_operand.vmem [shape: f32[32,16], index: 2, kind: input, shape index: {}]   ;;  %s1613_s3 = inlined_call_operand.vmem [shape: f32[32,32], index: 3, kind: input, shape index: {}]   ;;  %s1614_s4 = inlined_call_operand.vmem [shape: f32[1,16], index: 4, kind: input, shape index: {}]   ;;  %s1615_s5 = inlined_call_operand.vmem [shape: f32[1,32], index: 5, kind: input, shape index: {}]   ;;  %s1616_s6 = inlined_call_operand.hbm [shape: f32[2,8,16], index: 6, kind: output, shape index: {}]  }
   0x1   :  { %13 = vsyncpa [#allocation7 + $0x1], 0 }
   0x2   :  { %14 = vsyncpa [#allocation8], 0 }
   0x3   :  { %16 = vsyncpa [#allocation8 + $0x1], 0  ;;  %s1417_s21 = smov 0   ;;  %s1419_s22 = smov 0  }
   0x4   :  { %s1421_s23 = smov 0   ;;  %s1423_s24 = smov 0  }
   0x5   :  { %s1425_s25 = smov 0   ;;  %s1427_s26 = smov 0  }
   0x6 LB: > { %s1118_s27 = sadd.s32 4294967295, %s1373_s26   ;;  %s1119_s28 = sadd.s32 4294967294, %s1373_s26   ;;  %s1373_s26 = sphi %s1427_s26, %s22_s26   ;;  %s1369_s25 = sphi %s1425_s25, %s1628_s25   ;;  %s1365_s24 = sphi %s1423_s24, %s1627_s24   ;;  %s1361_s23 = sphi %s1421_s23, %s1626_s23   ;;  %s1357_s22 = sphi %s1419_s22, %s1625_s22   ;;  %s1353_s21 = sphi %s1417_s21, %s1624_s21  }
   0x7   : > { %s41_s29 = sadd.s32 1, %s1369_s25  ;;  %s78_s30 = sadd.s32 1, %s1361_s23 }
   0x8   : > { %p43_p0 = scmp.ge.s32.totalorder %s41_s29, 2  ;;  %p85_p1 = scmp.ne.s32.totalorder %s1361_s23, %s1357_s22 }
   0x9   : > { %p86_p2 = scmp.eq.s32.totalorder %s1373_s26, 0  ;;  %p91_p3 = scmp.ne.s32.totalorder %s1357_s22, %s1353_s21 }
   0xa   : > { %s1630_s29 = smov (%p43_p0, %s41_s29), 0  ;;  %p92_p5 = scmp.eq.s32.totalorder %s1118_s27, 0 }
   0xb   : > { %p1458_p4 = por %p86_p2, %p85_p1  ;;  %s73_s8 = ssub.s32 %s1369_s25, %s1630_s29 }
   0xc   : > { %p201_p6 = scmp.eq.s32.totalorder %s1118_s27, 1  ;;  %p76_p7 = scmp.eq.s32.totalorder %s73_s8, 0 }
   0xd   : > { %p1464_p8 = por %p92_p5, %p91_p3  ;;  %p207_p10 = scmp.eq.s32.totalorder %s1119_s28, 1 }
   0xe   : > { %p1468_p9 = por %p201_p6, %p85_p1  ;;  %p1202_p13 = scmp.lt.s32.totalorder %s1373_s26, 2 }
   0xf   : > { %s1473_s11 = scalar_select %p76_p7, %s1361_s23, %s78_s30  }
  0x10   : > { %p1475_p11 = por %p207_p10, %p91_p3  ;;  %s249_s13 = sand.u32 1, %s1361_s23  }
  0x11   : > { %s1122_s14 = sshll.u32 %s249_s13, 3  ;;  %s1123_s15 = sshll.u32 %s1369_s25, 7 }
  0x12   : > { %s1620_s12 = scalar_select %p1475_p11, 1, 0 }
  0x13   : > { %s259_s18 = scalar_lea.hbm %s1611_s1, %s1123_s15  ;;  %s253_s19 = scalar_lea.vmem [#allocation6], %s1122_s14 }
  0x14   : > { %s261_s20 = sshll.u32 %s253_s19, 4  ;;  %p1488_p0 = pnand %p1202_p13, %p1458_p4  ;;  %s262_s20 = int_to_ptr.vmem [resolvable:$true] %s261_s20 }
  0x15   : > { %p1124_p1 = scmp.ge.s32.totalorder %s1373_s26, 1  ;;  %p266_p2 = scmp.lt.s32.totalorder %s1373_s26, 3 }
  0x16   : > { %s250_s28 = scalar_lea.sflag [#allocation7], %s249_s13  ;;  %p1267_p3 = pneg %p1488_p0 }
  0x17   : > { %s1278_s30 = scalar_lea.vmem %s262_s20, 128  ;;  %s1375_s8 = smov [#allocation6]  }
  0x18   : > { %p1279_p5 = scmp.ne.s32.totalorder %s262_s20, %s1278_s30  ;;  %s1283_s15 = sshll.u32 %s1375_s8, 4  ;;  %s1284_s15 = int_to_ptr.vmem [resolvable:$false] %s1283_s15 }
  0x19   : > { %s1285_s14 = scalar_lea.vmem %s1284_s15, 256  ;;  %p1286_p10 = scmp.lt.s32.totalorder %s262_s20, %s1284_s15 }
  0x1a   : > { %p1281_p6 = pnand %p1279_p5, %p1267_p3  ;;  %p1287_p12 = scmp.lt.s32.totalorder %s1285_s14, %s1278_s30 }
  0x1c   : > { %p1282_p7 = pneg %p1281_p6  ;;  %p1288_p4 = por %p1287_p12, %p1286_p10 }
  0x1e   : > { %p1289_p13 = pnand %p1288_p4, %p1282_p7 }
  0x20   : > { %1292 = shalt.err (!%p1289_p13)
}
  0x21   : > { %1197 = dma.hbm_to_vmem [thread:$0]  (!%p1488_p0), %s259_s18, 128, %s262_s20, %s250_s28  }
  0x22   : > { %p267_p11 = pnand %p1124_p1, %p266_p2 }
  0x23   : > { %s1503_s7 = sand.u32 (!%p267_p11), 1, %s1357_s22  }
  0x24   : > { %270 = sbr.rel (%p267_p11) target bundleno = 1036 (0x40c), region = 44  ;;  %s1125_s13 = sshll.u32 (!%p267_p11), %s1503_s7, 3 }
  0x25   : > { %s273_s16 = scalar_lea.sflag (!%p267_p11), [#allocation7], %s1503_s7  ;;  %s1509_s17 = scalar_lea.vmem (!%p267_p11), [#allocation6], %s1125_s13 }
  0x29   : > { %1344 = dma.done.wait (%p1464_p8), %s273_s16, 128  }
  0x2a   : > { %1346 = vsyncadd (%p1464_p8), %s273_s16, 4294967168  ;;  %p312_p11 = scmp.lt.s32.totalorder %s1365_s24, 1  ;;  %v1376_v0 = vmov 0.0   ;;  %vm1377_vm0 = vmmov 0   ;;  %v329_v1 = vld [vmem:[%s1612_s2 + $0x18] sm:$0xff]  ;;  %v328_v2 = vld [vmem:[%s1612_s2 + $0x10] sm:$0xff]  ;;  %v870_v23 = vlaneseq }
  0x2b   : > { %1158 = vmatprep.subr.mxu0 %v1376_v0  ;;  %1169 = vmatprep.subr.mxu1 %v1376_v0  ;;  %v710_v3 = vld [vmem:[%s1613_s3 + $0x18] sm:$0xff]  ;;  %v709_v4 = vld [vmem:[%s1613_s3 + $0x10] sm:$0xff]  ;;  %v327_v5 = vld [vmem:[%s1612_s2 + $0x8] sm:$0xff]  ;;  %vm337_vm1 = vcmask 261120   ;;  %vm412_vm2 = vcmask 130048   ;;  %s1378_s27 = smov 112  }
  0x2c   : > { %1166 = vmatprep.mubr.msk.f32.mxu0 %vm1377_vm0, %v1376_v0  ;;  %s313_s18 = scalar_select %p312_p11, %s1365_s24, 1  ;;  %1177 = vmatprep.mubr.msk.f32.mxu1 %vm1377_vm0, %v1376_v0  ;;  %v708_v6 = vld [vmem:[%s1613_s3 + $0x8] sm:$0xff]  ;;  %v326_v7 = vld [vmem:[%s1612_s2] sm:$0xff]  ;;  %417 = vst.msk [vmem:[#allocation5] sm:$0xff] %vm412_vm2, %v1376_v0  ;;  %vm414_vm3 = vcmask 7168   ;;  %v1379_v21 = vmov -inf  }
  0x2d   : > { %1159 = vmatpush3.msra.mxu0 %v329_v1  ;;  %1170 = vmatpush3.msra.mxu1 %v710_v3  ;;  %v707_v9 = vld [vmem:[%s1613_s3] sm:$0xff]  ;;  %415 = vst.msk [vmem:[#allocation3] sm:$0xff] %vm414_vm3, %v1379_v21  ;;  %416 = vst.msk [vmem:[#allocation4] sm:$0xff] %vm414_vm3, %v1376_v0  ;;  %v871_v24 = vshrl.u32 %v870_v23, 7  ;;  %v875_v25 = vand.u32 127, %v870_v23  ;;  %vm881_vm5 = vcmask 64512  }
  0x2e   : > { %s1127_s19 = sshll.u32 %s313_s18, 3  ;;  %1160 = vmatprep.subr.mxu0 %v1376_v0  ;;  %1171 = vmatprep.subr.mxu1 %v1376_v0  ;;  %v706_v10 = vld [vmem:[%s1509_s17] sm:$0xff]  ;;  %v1380_v30 = vmov 0   ;;  %s311_s9 = scalar_lea.vmem [#allocation9], %s1125_s13 }
  0x2f   : > { %s318_s28 = scalar_lea.vmem %s1610_s0, %s1127_s19  ;;  %1161 = vmatpush3.msra.mxu0 %v328_v2  ;;  %1172 = vmatpush3.msra.mxu1 %v709_v4  ;;  %v1128_v11 = vld [vmem:[%s1614_s4] ss:$0 sm:$0xff]  ;;  %vm878_vm4 = vcmp.le.s32.totalorder %v875_v25, %v871_v24  ;;  %s1020_s30 = sshll.u32 %s311_s9, 4  ;;  %s1021_s30 = int_to_ptr.vmem [resolvable:$true] %s1020_s30 }
  0x30   : > { %1162 = vmatprep.subr.mxu0 %v1376_v0  ;;  %v325_v8 = vld [vmem:[%s318_s28] sm:$0xff]  ;;  %1173 = vmatprep.subr.mxu1 %v1376_v0  ;;  %s1141_s28 = sshll.u32 %s1365_s24, 7  ;;  %s1006_s16 = scalar_lea.sflag [#allocation8], %s1503_s7 }
  0x31   : > { %1163 = vmatpush3.msra.mxu0 %v327_v5  ;;  %1174 = vmatpush3.msra.mxu1 %v708_v6  ;;  %v1135_v12 = vld [vmem:[%s1615_s5] ss:$0 sm:$0xff]  ;;  %s1018_s14 = scalar_lea.hbm %s1616_s6, %s1141_s28  ;;  %s1293_s19 = scalar_lea.vmem %s1021_s30, 128 }
  0x32   : > { %1164 = vmatprep.subr.mxu0 %v1376_v0  ;;  %1175 = vmatprep.subr.mxu1 %v1376_v0  ;;  %p1294_p8 = scmp.ne.s32.totalorder %s1021_s30, %s1293_s19  ;;  %s1381_s24 = smov [#allocation9]  }
  0x33   : > { %1165 = vmatpush3.msra.mxu0 %v326_v7  ;;  %1176 = vmatpush3.msra.mxu1 %v707_v9  ;;  %v905_v48 = vld [vmem:[#allocation5] sm:$0xff]  ;;  %s1297_s18 = sshll.u32 %s1381_s24, 4  ;;  %s1298_s18 = int_to_ptr.vmem [resolvable:$false] %s1297_s18 }
  0x34   : > { %1167 = vmatmul.mubr.msk.f32.vlgmr.msra.gmra.mxu0 %vm337_vm1, %v325_v8  ;;  %1178 = vmatmul.mubr.msk.f32.vlgmr.msra.gmra.mxu1 %vm337_vm1, %v706_v10  ;;  %v880_v31 = vld [vmem:[#allocation3] sm:$0xff]  ;;  %v897_v42 = vld [vmem:[#allocation4] sm:$0xff]  ;;  %p1295_p12 = pnand %p1294_p8, %p1468_p9  ;;  %s1299_s13 = scalar_lea.vmem %s1298_s18, 256 }
  0x35   : > { %1180 = vmatprep.subr.mxu0 %v1376_v0  ;;  %1182 = vmatprep.mubr.msk.f32.mxu0 %vm1377_vm0, %v1376_v0  ;;  %p1300_p1 = scmp.lt.s32.totalorder %s1021_s30, %s1298_s18  ;;  %p1301_p2 = scmp.lt.s32.totalorder %s1299_s13, %s1293_s19 }
  0x36   : > { %1185 = vmatprep.subr.mxu1 %v1376_v0  ;;  %1187 = vmatprep.mubr.msk.f32.mxu1 %vm1377_vm0, %v1376_v0  ;;  %p1296_p0 = pneg %p1295_p12 }
  0x37   : > { %1257 = vset.pattern.permute.xlu0 %v1380_v30  ;;  %1258 = vset.pattern.permute.xlu1 %v1380_v30  ;;  %p1302_p3 = por %p1301_p2, %p1300_p1 }
  0x39   : > { %p1303_p5 = pnand %p1302_p3, %p1296_p0 }
  0xf4   : > { %v407_v13 = vpop.f32.mrf.mxu0  ;;  %v788_v15 = vpop.f32.mrf.mxu1 }
  0xf5   : > { %v408_v14 = vadd.f32 %v1128_v11, %v407_v13  ;;  %v789_v17 = vadd.f32 %v1135_v12, %v788_v15 }
  0xf6   : > { %v1168_v16 = vpop.f32.mrf.mxu0  ;;  %v1179_v19 = vpop.f32.mrf.mxu1 }
  0xf7   : > { %v411_v18 = vmul.f32 0.25, %v408_v14  ;;  %912 = vrot.lane.b32.xlu1 %v789_v17, %s1378_s27  ;;  %1181 = vmatpush3.xpose.msk.msra.mxu0 %vm412_vm2, %v789_v17 }
  0xf9   : > { %413 = vst.msk [vmem:[#allocation2] sm:$0xff] %vm412_vm2, %v411_v18 }
 0x100   : > { %v792_v20 = vld [vmem:[#allocation2] sm:$0xff] }
 0x101   : > { %1183 = vmatmul.mubr.msk.f32.vlgmr.msra.gmra.mxu0 %vm412_vm2, %v792_v20 }
 0x169   : > { %v913_v22 = vpop.permute.xlu1 %912 }
 0x16a   : > { %1186 = vmatpush3.msra.mxu1 %v913_v22 }
 0x1c1   : > { %v866_v26 = vpop.f32.mrf.mxu0 }
 0x1c2   : > { %v879_v27 = vsel %vm878_vm4, %v866_v26, -inf }
 0x1c3   : > { %v1184_v28 = vpop.f32.mrf.mxu0  ;;  %v882_v29 = vsel %vm881_vm5, %v879_v27, -inf }
 0x1c4   : > { %883 = vmax.xlane.f32.xlu0 %v882_v29 }
 0x24d   : > { %v884_v32 = vpop.xlane.xlu0 %883 }
 0x24e   : > { %v885_v33 = vmax.f32 %v880_v31, %v884_v32 }
 0x250   : > { %v886_v34 = vsub.f32 %v880_v31, %v885_v33  ;;  %990 = vst.msk [vmem:[#allocation3] sm:$0xff] %vm414_vm3, %v885_v33  ;;  %891 = vperm.xlu0 %1257, %v885_v33  }
 0x252   : > { %v887_v39 = vmul.f32 1.442695, %v886_v34 }
 0x2cb   : > { %v892_v35 = vpop.permute.xlu0 %891 }
 0x2cc   : > { %v894_v36 = vsub.f32 %v879_v27, %v892_v35 }
 0x2ce   : > { %v895_v37 = vmul.f32 1.442695, %v894_v36 }
 0x2d0   : > { %1259 = vpow2.f32 %v895_v37 }
 0x2d1   : > { %1261 = vpow2.f32 %v887_v39 }
 0x2dd   : > { %v1260_v38 = vpop.eup %1259 }
 0x2de   : > { %1188 = vmatmul.mubr.msk.f32.vlgmr.msra.gmra.mxu1 %vm881_vm5, %v1260_v38  ;;  %v899_v40 = vsel %vm881_vm5, %v1260_v38, 0.0  ;;  %v1262_v41 = vpop.eup %1261 }
 0x2df   : > { %900 = vadd.xlane.f32.xlu1 %v899_v40  ;;  %v898_v43 = vmul.f32 %v1262_v41, %v897_v42 }
 0x2f0   : > { %908 = vperm.xlu1 %1258, %v1262_v41  }
 0x368   : > { %v901_v44 = vpop.xlane.xlu1 %900 }
 0x369   : > { %v902_v45 = vadd.f32 %v901_v44, %v898_v43 }
 0x36b   : > { %904 = vst.msk [vmem:[#allocation4] sm:$0xff] %vm414_vm3, %v902_v45 }
 0x36c   : > { %v909_v49 = vpop.permute.xlu1 %908 }
 0x36d   : > { %v911_v50 = vmul.f32 %v909_v49, %v905_v48 }
 0x372   : > { %v994_v46 = vld [vmem:[#allocation4] sm:$0xff] }
 0x373   : > { %1263 = vrcp.f32 %v994_v46 }
 0x380   : > { %v1264_v47 = vpop.eup %1263 }
 0x381   : > { %999 = vperm.xlu0 %1257, %v1264_v47  }
 0x39e   : > { %v984_v51 = vpop.f32.mrf.mxu1 }
 0x39f   : > { %v988_v52 = vadd.f32 %v984_v51, %v911_v50 }
 0x3a0   : > { %v1189_v53 = vpop.f32.mrf.mxu1 }
 0x3a1   : > { %989 = vst.msk [vmem:[#allocation5] sm:$0xff] %vm412_vm2, %v988_v52 }
 0x3a8   : > { %v996_v54 = vld [vmem:[#allocation5] sm:$0xff] }
 0x3fc   : > { %v1000_v55 = vpop.permute.xlu0 %999 }
 0x3fd   : > { %v1002_v56 = vmul.f32 %v1000_v55, %v996_v54 }
 0x3ff   : > { %1004 = vst.msk [vmem:[%s311_s9] sm:$0xff] %vm412_vm2, %v1002_v56 }
 0x400   : > { %1306 = shalt.err (!%p1303_p5)
}
 0x401   : > { %s1307_s20 = scalar_lea.hbm %s1018_s14, 128  ;;  %s1311_s27 = scalar_lea.hbm %s1616_s6, 256 }
 0x402   : > { %p1308_p6 = scmp.ne.s32.totalorder %s1018_s14, %s1307_s20  ;;  %p1312_p4 = scmp.lt.s32.totalorder %s1018_s14, %s1616_s6 }
 0x403   : > { %p1313_p13 = scmp.lt.s32.totalorder %s1311_s27, %s1307_s20 }
 0x404   : > { %p1309_p7 = pnand %p1308_p6, %p1468_p9 }
 0x405   : > { %p1314_p11 = por %p1313_p13, %p1312_p4 }
 0x406   : > { %p1310_p10 = pneg %p1309_p7 }
 0x408   : > { %p1315_p8 = pnand %p1314_p11, %p1310_p10 }
 0x40a   : > { %1318 = shalt.err (!%p1315_p8)
}
 0x40b   : > { %1192 = dma.vmem_to_hbm [thread:$0]  (%p1468_p9), %s1021_s30, 128, %s1018_s14, %s1006_s16  }
 0x40c PF: > { %s1032_s8 = sand.u32 1, %s1353_s21   ;;  %p1622_p12 = scmp.ne.s32.totalorder %s1620_s12, 0 }
 0x40d   : > { %p1623_p0 = scmp.ge.s32.totalorder %s1373_s26, 2  ;;  %s1033_s15 = scalar_lea.sflag [#allocation8], %s1032_s8 }
 0x40f   : > { %p1199_p1 = pnand %p1623_p0, %p1622_p12 }
 0x411   : > { %p1200_p2 = pneg %p1199_p1 }
 0x413   : > { %1348 = dma.done.wait (%p1200_p2), %s1033_s15, 128  }
 0x414   : > { %1350 = vsyncadd (%p1200_p2), %s1033_s15, 4294967168  ;;  %s22_s26 = sadd.s32 1, %s1373_s26   ;;  %s1624_s21 = smov %s1357_s22 }
 0x415   : > { %p19_p3 = scmp.ge.s32.totalorder %s22_s26, 4   ;;  %s1625_s22 = smov %s1361_s23 }
 0x416   : > { %s1626_s23 = smov %s1473_s11  ;;  %s1627_s24 = smov %s1369_s25 }
 0x417   : > { %s1628_s25 = smov %s1630_s29  ;;  %21 = sbr.rel (!%p19_p3) target bundleno = 6 (0x6), region = 108 }
 0x41c   :  { %1038 = vsyncpa [#allocation7], 1 }
 0x41d   :  { %1040 = vsyncpa [#allocation7 + $0x1], 1 }
 0x41e   :  { %1041 = vsyncpa [#allocation8], 1 }
 0x41f   :  { %1043 = vsyncpa [#allocation8 + $0x1], 1 }

</bundles_post_ra>
